<compile_context>
chip_gen: v7x
topology: tpu7x:2x2x1
jax: 0.10.0
libtpu: 0.0.40
codegen_flags: <defaults>
</compile_context>

<pallas_src>
import jax
import jax.numpy as jnp
from jax.experimental import pallas as pl
from jax.experimental.pallas import tpu as pltpu

_SUBLANE = 8


def _round_up(n, m):
    return ((n + m - 1) // m) * m


def _leaky_relu(x, slope=0.01):
    return jnp.where(x > 0, x, slope * x)


def mlp_kernel(x_ref, w1_ref, b1_ref, w2_ref, b2_ref, o_ref):
    # fnn1: x @ W1 + b1  (MXU matmul, f32 accumulate), then LeakyReLU(0.01)
    h = jnp.dot(x_ref[...], w1_ref[...], preferred_element_type=jnp.float32)
    h = _leaky_relu(h + b1_ref[...])
    # fnn2: h @ W2 + b2, then LeakyReLU on the output layer (default config)
    y = jnp.dot(h, w2_ref[...], preferred_element_type=jnp.float32)
    y = _leaky_relu(y + b2_ref[...])
    o_ref[...] = y.astype(o_ref.dtype)


def neural_net_forward(x, w1, b1, w2, b2, *, tm=512):
    """x: [B, input_size], w1: [input_size, hidden], b1: [hidden] or [1, hidden],
       w2: [hidden, output], b2: [output] or [1, output] -> [B, output]."""
    B, in_size = x.shape
    hid = w1.shape[1]
    out_size = w2.shape[1]
    dt = x.dtype

    b1 = b1.reshape(1, hid)
    b2 = b2.reshape(1, out_size)

    # Only pad the batch to a multiple of 8 sublanes (no-op when already aligned).
    b_p = _round_up(B, _SUBLANE)
    xp = x if b_p == B else jnp.zeros((b_p, in_size), dt).at[:B].set(x)

    # Batch tile: multiple of 8, capped at tm; split into >=2 grid steps whenever the
    # batch allows it so v7x's second TensorCore gets work ("parallel" batch axis).
    tm_eff = min(tm, max(_SUBLANE, _round_up(pl.cdiv(b_p, 2), _SUBLANE)))
    grid = (pl.cdiv(b_p, tm_eff),)

    itemsize = jnp.dtype(dt).itemsize
    cost = pl.CostEstimate(
        flops=2 * b_p * (in_size * hid + hid * out_size),
        transcendentals=0,
        bytes_accessed=(b_p * in_size + in_size * hid + hid
                        + hid * out_size + out_size + b_p * out_size) * itemsize,
    )

    out = pl.pallas_call(
        mlp_kernel,
        out_shape=jax.ShapeDtypeStruct((b_p, out_size), dt),
        grid_spec=pltpu.PrefetchScalarGridSpec(
            num_scalar_prefetch=0,
            grid=grid,
            in_specs=[
                pl.BlockSpec((tm_eff, in_size), lambda i: (i, 0)),  # x: tiled over batch
                pl.BlockSpec((in_size, hid), lambda i: (0, 0)),     # w1: VMEM-resident
                pl.BlockSpec((1, hid), lambda i: (0, 0)),           # b1: VMEM-resident
                pl.BlockSpec((hid, out_size), lambda i: (0, 0)),    # w2: VMEM-resident
                pl.BlockSpec((1, out_size), lambda i: (0, 0)),      # b2: VMEM-resident
            ],
            out_specs=pl.BlockSpec((tm_eff, out_size), lambda i: (i, 0)),
        ),
        compiler_params=pltpu.CompilerParams(
            dimension_semantics=("parallel",),  # shards batch tiles across TCs on v7x
        ),
        cost_estimate=cost,
    )(xp, w1, b1, w2, b2)

    return out if b_p == B else out[:B]


def init_params(key, input_size, hidden_size, output_size, dtype=jnp.float32):
    """Deterministic PyTorch-style (uniform +/-1/sqrt(fan_in)) init."""
    k1, k2, k3, k4 = jax.random.split(key, 4)
    lim1 = 1.0 / jnp.sqrt(jnp.float32(input_size))
    lim2 = 1.0 / jnp.sqrt(jnp.float32(hidden_size))
    # stored as [in, out] (i.e. transpose of PyTorch's [out, in])
    w1 = jax.random.uniform(k1, (input_size, hidden_size), dtype, -lim1, lim1)
    b1 = jax.random.uniform(k2, (1, hidden_size), dtype, -lim1, lim1)
    w2 = jax.random.uniform(k3, (hidden_size, output_size), dtype, -lim2, lim2)
    b2 = jax.random.uniform(k4, (1, output_size), dtype, -lim2, lim2)
    return w1, b1, w2, b2


def _reference(x, w1, b1, w2, b2):
    ref = x @ w1 + b1
    ref = jnp.where(ref > 0, ref, 0.01 * ref)
    ref = ref @ w2 + b2
    ref = jnp.where(ref > 0, ref, 0.01 * ref)
    return ref


if __name__ == "__main__":
    key = jax.random.PRNGKey(0)
    kx, kx2, kx3, kp = jax.random.split(key, 4)

    input_size = 32
    hidden_size = 64
    output_size = 16
    w1, b1, w2, b2 = init_params(kp, input_size, hidden_size, output_size)

    # Small shape consistent with the module (single grid step, no padding at all).
    batch = 8
    x = jax.random.normal(kx, (batch, input_size), jnp.float32)
    out = jax.block_until_ready(neural_net_forward(x, w1, b1, w2, b2))
    ref = _reference(x, w1, b1, w2, b2)
    assert out.shape == (batch, output_size)
    assert jnp.allclose(out, ref, atol=1e-5, rtol=1e-5)

    # Non-multiple-of-8 batch: exercises the 8-row batch pad, 2 grid steps and the
    # final slice (200 -> 208 rows, tile 104, grid=(2,)).
    batch2 = 200
    x2 = jax.random.normal(kx2, (batch2, input_size), jnp.float32)
    out2 = jax.block_until_ready(neural_net_forward(x2, w1, b1, w2, b2))
    ref2 = _reference(x2, w1, b1, w2, b2)
    assert out2.shape == (batch2, output_size)
    assert jnp.allclose(out2, ref2, atol=1e-5, rtol=1e-5)

    # Batch large enough to use the full 512-row tile with a partial last tile
    # (1104 rows, grid=(3,), last tile only 80 valid rows -> masked store).
    batch3 = 1100
    x3 = jax.random.normal(kx3, (batch3, input_size), jnp.float32)
    out3 = jax.block_until_ready(neural_net_forward(x3, w1, b1, w2, b2))
    ref3 = _reference(x3, w1, b1, w2, b2)
    assert out3.shape == (batch3, output_size)
    assert jnp.allclose(out3, ref3, atol=1e-5, rtol=1e-5)

    print("KERNEL_OK")
</pallas_src>

<mosaic_0001>
module attributes {stable_mosaic.version = 11 : i64} {
  func.func @mlp_kernel(%arg0: i32, %arg1: memref<8x32xf32, #tpu.memory_space<vmem>>, %arg2: memref<32x64xf32, #tpu.memory_space<vmem>>, %arg3: memref<1x64xf32, #tpu.memory_space<vmem>>, %arg4: memref<64x16xf32, #tpu.memory_space<vmem>>, %arg5: memref<1x16xf32, #tpu.memory_space<vmem>>, %arg6: memref<8x16xf32, #tpu.memory_space<vmem>>) attributes {dimension_semantics = [#tpu.dimension_semantics<parallel>], iteration_bounds = array<i64: 1>, scalar_prefetch = 0 : i64, scratch_operands = 0 : i64, tpu.core_type = #tpu.core_type<tc>, window_params = [{transform_indices = @transform_0, window_bounds = array<i64: 8, 32>}, {pipeline_mode = #tpu.pipeline_mode<synchronous>, transform_indices = @transform_1, window_bounds = array<i64: 32, 64>}, {pipeline_mode = #tpu.pipeline_mode<synchronous>, transform_indices = @transform_2, window_bounds = array<i64: 1, 64>}, {pipeline_mode = #tpu.pipeline_mode<synchronous>, transform_indices = @transform_3, window_bounds = array<i64: 64, 16>}, {pipeline_mode = #tpu.pipeline_mode<synchronous>, transform_indices = @transform_4, window_bounds = array<i64: 1, 16>}, {transform_indices = @transform_5, window_bounds = array<i64: 8, 16>}]} {
    %c0 = arith.constant 0 : index
    %c0_0 = arith.constant 0 : index
    %0 = vector.load %arg1[%c0, %c0_0] : memref<8x32xf32, #tpu.memory_space<vmem>>, vector<8x32xf32>
    %c0_1 = arith.constant 0 : index
    %c0_2 = arith.constant 0 : index
    %1 = vector.load %arg2[%c0_1, %c0_2] : memref<32x64xf32, #tpu.memory_space<vmem>>, vector<32x64xf32>
    %cst = arith.constant dense<0.000000e+00> : vector<8x64xf32>
    %2 = tpu.matmul %0, %1, %cst {dimension_numbers = #tpu.dot_dimension_numbers<[1], [0], [0], [1], [0, 0, 1, 1], [], []>} : vector<8x32xf32>, vector<32x64xf32>, vector<8x64xf32> -> vector<8x64xf32>
    %c0_3 = arith.constant 0 : index
    %c0_4 = arith.constant 0 : index
    %3 = vector.load %arg3[%c0_3, %c0_4] : memref<1x64xf32, #tpu.memory_space<vmem>>, vector<1x64xf32>
    %4 = vector.broadcast %3 : vector<1x64xf32> to vector<8x64xf32>
    %5 = arith.addf %2, %4 : vector<8x64xf32>
    %cst_5 = arith.constant 0.000000e+00 : f32
    %6 = vector.broadcast %cst_5 : f32 to vector<8x64xf32>
    %7 = arith.cmpf ogt, %5, %6 : vector<8x64xf32>
    %cst_6 = arith.constant 0.00999999977 : f32
    %8 = vector.broadcast %cst_6 : f32 to vector<8x64xf32>
    %9 = arith.mulf %8, %5 : vector<8x64xf32>
    %10 = arith.select %7, %5, %9 : vector<8x64xi1>, vector<8x64xf32>
    %c0_7 = arith.constant 0 : index
    %c0_8 = arith.constant 0 : index
    %11 = vector.load %arg4[%c0_7, %c0_8] : memref<64x16xf32, #tpu.memory_space<vmem>>, vector<64x16xf32>
    %cst_9 = arith.constant dense<0.000000e+00> : vector<8x16xf32>
    %12 = tpu.matmul %10, %11, %cst_9 {dimension_numbers = #tpu.dot_dimension_numbers<[1], [0], [0], [1], [0, 0, 1, 1], [], []>} : vector<8x64xf32>, vector<64x16xf32>, vector<8x16xf32> -> vector<8x16xf32>
    %c0_10 = arith.constant 0 : index
    %c0_11 = arith.constant 0 : index
    %13 = vector.load %arg5[%c0_10, %c0_11] : memref<1x16xf32, #tpu.memory_space<vmem>>, vector<1x16xf32>
    %14 = vector.broadcast %13 : vector<1x16xf32> to vector<8x16xf32>
    %15 = arith.addf %12, %14 : vector<8x16xf32>
    %cst_12 = arith.constant 0.000000e+00 : f32
    %16 = vector.broadcast %cst_12 : f32 to vector<8x16xf32>
    %17 = arith.cmpf ogt, %15, %16 : vector<8x16xf32>
    %cst_13 = arith.constant 0.00999999977 : f32
    %18 = vector.broadcast %cst_13 : f32 to vector<8x16xf32>
    %19 = arith.mulf %18, %15 : vector<8x16xf32>
    %20 = arith.select %17, %15, %19 : vector<8x16xi1>, vector<8x16xf32>
    %c0_14 = arith.constant 0 : index
    %c0_15 = arith.constant 0 : index
    %21 = vector.load %arg6[%c0_14, %c0_15] : memref<8x16xf32, #tpu.memory_space<vmem>>, vector<8x16xf32>
    tpu.vector_store %arg6[%c0_14, %c0_15], %20 {strides = array<i32>} : memref<8x16xf32, #tpu.memory_space<vmem>>, vector<8x16xf32>,
    return
  }
  func.func @transform_0(%arg0: i32) -> (i32, i32) {
    %c0_i32 = arith.constant 0 : i32
    %c0_i32_0 = arith.constant 0 : i32
    return %arg0, %c0_i32 : i32, i32
  }
  func.func @transform_1(%arg0: i32) -> (i32, i32) {
    %c0_i32 = arith.constant 0 : i32
    %c0_i32_0 = arith.constant 0 : i32
    %c0_i32_1 = arith.constant 0 : i32
    return %c0_i32, %c0_i32_0 : i32, i32
  }
  func.func @transform_2(%arg0: i32) -> (i32, i32) {
    %c0_i32 = arith.constant 0 : i32
    %c0_i32_0 = arith.constant 0 : i32
    %c0_i32_1 = arith.constant 0 : i32
    return %c0_i32, %c0_i32_0 : i32, i32
  }
  func.func @transform_3(%arg0: i32) -> (i32, i32) {
    %c0_i32 = arith.constant 0 : i32
    %c0_i32_0 = arith.constant 0 : i32
    %c0_i32_1 = arith.constant 0 : i32
    return %c0_i32, %c0_i32_0 : i32, i32
  }
  func.func @transform_4(%arg0: i32) -> (i32, i32) {
    %c0_i32 = arith.constant 0 : i32
    %c0_i32_0 = arith.constant 0 : i32
    %c0_i32_1 = arith.constant 0 : i32
    return %c0_i32, %c0_i32_0 : i32, i32
  }
  func.func @transform_5(%arg0: i32) -> (i32, i32) {
    %c0_i32 = arith.constant 0 : i32
    %c0_i32_0 = arith.constant 0 : i32
    return %arg0, %c0_i32 : i32, i32
  }
}

</mosaic_0001>

<bundles_post_ra>
// kernel: tpu_custom_call.1
= control target key start
LH: loop header
LB: loop body
LE: loop exit
PB: predicated region body
PF: predicated region fallthrough
CT: control target
= control target key end

     0   :  { %v312_v3 = vmov 0.0|0.0   ;;  %vm313_vm0 = vmmov 0   ;;  %v314_v6 = vmov 0.0   ;;  %s403_s0 = inlined_call_operand.vmem [shape: f32[8,32], index: 0, kind: input, shape index: {}]   ;;  %s404_s1 = inlined_call_operand.vmem [shape: f32[32,64], index: 1, kind: input, shape index: {}]   ;;  %s405_s2 = inlined_call_operand.vmem [shape: f32[1,64], index: 2, kind: input, shape index: {}]   ;;  %s406_s3 = inlined_call_operand.vmem [shape: f32[64,16], index: 3, kind: input, shape index: {}]   ;;  %s407_s4 = inlined_call_operand.vmem [shape: f32[1,16], index: 4, kind: input, shape index: {}]   ;;  %s408_s5 = inlined_call_operand.hbm [shape: f32[8,16], index: 5, kind: output, shape index: {}]  }
   0x1   :  { %v22_v0 = vld [vmem:[%s404_s1] sm:$0xff]  ;;  %v23_v1 = vld [vmem:[%s404_s1 + $0x8] sm:$0xff]  ;;  %v24_v2 = vld [vmem:[%s404_s1 + $0x10] sm:$0xff]  ;;  %266 = vmatprep.subr.bf16.mxu0 %v312_v3  ;;  %244 = vmatprep.mubr.msk.f32.mxu0 %vm313_vm0, %v314_v6 }
   0x2   :  { %v267_v4 = vpack.c.bf16 %v23_v1, %v22_v0  ;;  %v25_v5 = vld [vmem:[%s404_s1 + $0x18] sm:$0xff]  ;;  %v110_v7 = vld [vmem:[%s406_s3] sm:$0xff]  ;;  %272 = vmatprep.subr.bf16.mxu1 %v312_v3  ;;  %v111_v8 = vld [vmem:[%s406_s3 + $0x8] sm:$0xff]  ;;  %263 = vmatprep.mubr.msk.f32.mxu1 %vm313_vm0, %v314_v6 }
   0x3   :  { %v112_v9 = vld [vmem:[%s406_s3 + $0x10] sm:$0xff]  ;;  %v113_v10 = vld [vmem:[%s406_s3 + $0x18] sm:$0xff]  ;;  %v270_v11 = vpack.c.bf16 %v25_v5, %v24_v2  ;;  %v273_v12 = vpack.c.bf16 %v111_v8, %v110_v7 }
   0x4   :  { %268 = vmatpush3.bf16.msra.mxu0 %v267_v4 }
   0x5   :  { %269 = vmatprep.subr.bf16.mxu0 %v312_v3 }
   0x6   :  { %10 = vsyncpa [#allocation3], 0  ;;  %274 = vmatpush3.bf16.msra.mxu1 %v273_v12  ;;  %v276_v13 = vpack.c.bf16 %v113_v10, %v112_v9  ;;  %v114_v14 = vld [vmem:[%s406_s3 + $0x20] sm:$0xff]  ;;  %v115_v15 = vld [vmem:[%s406_s3 + $0x28] sm:$0xff]  ;;  %vm33_vm1 = vcmask 261120   ;;  %vm125_vm3 = vcmask 523264  }
   0x7   :  { %275 = vmatprep.subr.bf16.mxu1 %v312_v3  ;;  %v21_v16 = vld [vmem:[%s403_s0] sm:$0xff]  ;;  %v279_v17 = vpack.c.bf16 %v115_v15, %v114_v14  ;;  %v116_v18 = vld [vmem:[%s406_s3 + $0x30] sm:$0xff]  ;;  %v117_v19 = vld [vmem:[%s406_s3 + $0x38] sm:$0xff]  ;;  %s315_s3 = smov [#allocation2]   ;;  %vm202_vm5 = vcmask 130048  }
   0x8   :  { %271 = vmatpush3.bf16.msra.mxu0 %v270_v11  ;;  %v282_v20 = vpack.c.bf16 %v117_v19, %v116_v18  ;;  %v218_v21 = vld [vmem:[%s405_s2] ss:$0 sm:$0xff]  ;;  %s210_s21 = sshll.u32 %s315_s3, 4  ;;  %s211_s21 = int_to_ptr.vmem [resolvable:$true] %s210_s21 }
   0x9   :  { %v220_v27 = vld [vmem:[%s407_s4] ss:$0 sm:$0xff]  ;;  %s288_s2 = scalar_lea.vmem %s211_s21, 128  ;;  %p293_p1 = scmp.lt.s32.totalorder %s211_s21, %s211_s21 }
   0xa   :  { %277 = vmatpush3.bf16.msra.mxu1 %v276_v13  ;;  %p289_p0 = scmp.ne.s32.totalorder %s211_s21, %s288_s2  ;;  %p294_p2 = scmp.lt.s32.totalorder %s288_s2, %s288_s2 }
   0xb   :  { %245 = vmatmul.mubr.msk.f32.vlgmr.msra.gmra.mrb[0].mxu0 %vm33_vm1, %v21_v16  ;;  %278 = vmatprep.subr.bf16.mxu1 %v312_v3 }
   0xc   :  { %p295_p3 = por %p294_p2, %p293_p1 }
   0xe   :  { %280 = vmatpush3.bf16.msra.mxu1 %v279_v17  ;;  %p296_p4 = pnand %p295_p3, %p289_p0 }
   0xf   :  { %281 = vmatprep.subr.bf16.mxu1 %v312_v3 }
  0x12   :  { %283 = vmatpush3.bf16.msra.mxu1 %v282_v20 }
  0xde   :  { %v103_v22 = vpop.f32.mrb[0].mxu0 }
  0xdf   :  { %v104_v23 = vadd.f32 %v218_v21, %v103_v22  ;;  %v246_v24 = vpop.f32.mrb[1].mxu0 }
  0xe1   :  { %vm107_vm2 = vcmp.gt.f32.partialorder %v104_v23, 0.0  ;;  %v108_v25 = vmul.f32 0.01, %v104_v23 }
  0xe3   :  { %v109_v26 = vsel %vm107_vm2, %v104_v23, %v108_v25 }
  0xe4   :  { %264 = vmatmul.mubr.msk.f32.vlgmr.msra.gmra.mrb[0].mxu1 %vm125_vm3, %v109_v26 }
 0x1b7   :  { %v195_v28 = vpop.f32.mrb[0].mxu1 }
 0x1b8   :  { %v196_v29 = vadd.f32 %v220_v27, %v195_v28  ;;  %v265_v30 = vpop.f32.mrb[1].mxu1 }
 0x1ba   :  { %v200_v31 = vmul.f32 0.01, %v196_v29  ;;  %vm199_vm4 = vcmp.gt.f32.partialorder %v196_v29, 0.0 }
 0x1bc   :  { %v201_v32 = vsel %vm199_vm4, %v196_v29, %v200_v31 }
 0x1bd   :  { %203 = vst.msk [vmem:[#allocation2] sm:$0xff] %vm202_vm5, %v201_v32 }
 0x1be   :  { %299 = shalt.err (!%p296_p4)
}
 0x1bf   :  { %s300_s23 = scalar_lea.hbm %s408_s5, 128 }
 0x1c0   :  { %p301_p5 = scmp.ne.s32.totalorder %s408_s5, %s300_s23  ;;  %p304_p6 = scmp.lt.u32.totalorder %s300_s23, %s408_s5 }
 0x1c2   :  { %p306_p7 = pnand %p304_p6, %p301_p5 }
 0x1c4   :  { %309 = shalt.err (!%p306_p7)
}
 0x1c5   :  { %213 = dma.vmem_to_hbm [thread:$0]  %s211_s21, 128, %s408_s5, [#allocation3]  }
 0x1c6   :  { %310 = dma.done.wait [#allocation3], 128  }
 0x1c7   :  { %311 = vsyncadd [#allocation3], 4294967168 }
 0x1c8   :  { %217 = vsyncpa [#allocation3], 1 }

</bundles_post_ra>
